<compile_context>
chip_gen: v6e
topology: v6e:2x2x1
jax: 0.10.0
libtpu: 0.0.40
codegen_flags: <defaults>
</compile_context>

<pallas_src>
import functools

import jax
import jax.numpy as jnp
from jax.experimental import pallas as pl
from jax.experimental.pallas import tpu as pltpu


def _round_up(x, m):
    return (x + m - 1) // m * m


# ----------------------------------------------------------------------------
# Kernel 1: conv-as-matmul (bf16 MXU, f32 accum) + per-tile partial batch stats.
#   y_tile(C, TM)      = W(C, K) @ patches_tile(K, TM)
#   stats_tile(C, 2)   = [sum_m y, sum_m y^2]          (written per grid step)
# ----------------------------------------------------------------------------
def conv_stats_kernel(w_ref, p_ref, y_ref, stats_ref):
    y = jnp.dot(w_ref[...], p_ref[...], preferred_element_type=jnp.float32)
    y_ref[...] = y
    # per-tile partial sums (channel axis = sublanes); lane reduction -> XLU,
    # which is idle under the MXU here.
    stats_ref[:, 0:1] = jnp.sum(y, axis=1, keepdims=True)
    stats_ref[:, 1:2] = jnp.sum(y * y, axis=1, keepdims=True)


# ----------------------------------------------------------------------------
# Kernel 2: fused affine batch-norm + LeakyReLU (purely mem-bound hot path).
#   scale/bias are per-channel (C, 1) and broadcast across the lane (M) axis.
# ----------------------------------------------------------------------------
def bn_lrelu_kernel(y_ref, scale_ref, bias_ref, o_ref, *, relu, slope):
    z = y_ref[...] * scale_ref[...] + bias_ref[...]
    if relu:
        z = jnp.where(z >= 0, z, slope * z)
    o_ref[...] = z


def basic_conv2d(x_nchw, weight, gamma, beta, *, stride=1, padding=0,
                 dilation=1, relu=True, eps=1e-5, negative_slope=0.01):
    """Forward of BasicConv2d. x_nchw: (N, Cin, H, W); weight: (Cout, Cin, KH, KW)."""
    x_nchw = x_nchw.astype(jnp.float32)
    N, Cin, H, W = x_nchw.shape
    Cout, _, KH, KW = weight.shape
    Ho = (H + 2 * padding - dilation * (KH - 1) - 1) // stride + 1
    Wo = (W + 2 * padding - dilation * (KW - 1) - 1) // stride + 1
    HoWo = Ho * Wo
    Kdim = Cin * KH * KW
    M_total = N * HoWo

    # ---- glue: NCHW-native transposed im2col, emitted directly in bf16 -------
    x_bf = x_nchw.astype(jnp.bfloat16)
    x_pad = jnp.pad(x_bf, ((0, 0), (0, 0),
                           (padding, padding), (padding, padding)))
    slabs = []
    for kh in range(KH):
        for kw in range(KW):
            h0, w0 = kh * dilation, kw * dilation
            slabs.append(
                x_pad[:, :, h0:h0 + (Ho - 1) * stride + 1:stride,
                            w0:w0 + (Wo - 1) * stride + 1:stride])  # (N,Cin,Ho,Wo)
    p = jnp.stack(slabs, axis=2)                       # (N, Cin, KH*KW, Ho, Wo)
    patches = p.reshape(N, Kdim, HoWo)                 # (N, K, M)  bf16

    # ---- TPU-friendly padding (zeros keep the math exact) --------------------
    C_pad = _round_up(Cout, 8)                         # sublanes only (not 128!)
    K_pad = _round_up(Kdim, 16)                        # bf16 sublane packing of W
    TM = min(512, _round_up(HoWo, 128))                # lane tile of M
    M_pad = _round_up(HoWo, TM)
    n_m = M_pad // TM

    patches_p = jnp.pad(patches, ((0, 0), (0, K_pad - Kdim), (0, M_pad - HoWo)))
    w_p = jnp.pad(weight.reshape(Cout, Kdim).astype(jnp.bfloat16),
                  ((0, C_pad - Cout), (0, K_pad - Kdim)))

    # ---- kernel 1: conv matmul + per-tile partial batch stats ----------------
    y, stats = pl.pallas_call(
        conv_stats_kernel,
        out_shape=(jax.ShapeDtypeStruct((N, C_pad, M_pad), jnp.float32),
                   jax.ShapeDtypeStruct((N, n_m, C_pad, 2), jnp.float32)),
        grid=(N, n_m),
        in_specs=[pl.BlockSpec((C_pad, K_pad), lambda n, m: (0, 0)),
                  pl.BlockSpec((None, K_pad, TM), lambda n, m: (n, 0, m))],
        out_specs=(pl.BlockSpec((None, C_pad, TM), lambda n, m: (n, 0, m)),
                   pl.BlockSpec((None, None, C_pad, 2),
                                lambda n, m: (n, m, 0, 0))),
        compiler_params=pltpu.CompilerParams(
            dimension_semantics=("parallel", "parallel")),
        cost_estimate=pl.CostEstimate(
            flops=2 * M_total * Kdim * Cout,
            transcendentals=0,
            bytes_accessed=int(patches_p.size * 2 + w_p.size * 2
                               + N * C_pad * M_pad * 4
                               + N * n_m * C_pad * 2 * 4)),
    )(w_p, patches_p)

    # ---- glue: reduce partial stats, fold BN affine into per-channel scale ---
    # Padded M columns and padded K rows are zero -> contribute 0 to both sums,
    # so dividing by the true M gives exact (biased, training-mode) batch stats.
    stats_sum = jnp.sum(stats, axis=(0, 1))            # (C_pad, 2)
    mean = stats_sum[:, 0] / M_total
    # TODO(synk): E[y^2]-E[y]^2 in f32 can cancel for very large M / large means;
    # a two-pass or split-accumulator scheme would be more robust at scale.
    var = jnp.maximum(stats_sum[:, 1] / M_total - mean * mean, 0.0)
    inv_std = jax.lax.rsqrt(var + eps)
    gamma_p = jnp.pad(gamma.astype(jnp.float32), (0, C_pad - Cout))
    beta_p = jnp.pad(beta.astype(jnp.float32), (0, C_pad - Cout))
    scale = (gamma_p * inv_std).reshape(C_pad, 1)
    bias = (beta_p - mean * gamma_p * inv_std).reshape(C_pad, 1)

    # ---- kernel 2: fused BN affine + LeakyReLU --------------------------------
    out = pl.pallas_call(
        functools.partial(bn_lrelu_kernel, relu=relu, slope=negative_slope),
        out_shape=jax.ShapeDtypeStruct((N, C_pad, M_pad), jnp.float32),
        grid=(N, n_m),
        in_specs=[pl.BlockSpec((None, C_pad, TM), lambda n, m: (n, 0, m)),
                  pl.BlockSpec((C_pad, 1), lambda n, m: (0, 0)),
                  pl.BlockSpec((C_pad, 1), lambda n, m: (0, 0))],
        out_specs=pl.BlockSpec((None, C_pad, TM), lambda n, m: (n, 0, m)),
        compiler_params=pltpu.CompilerParams(
            dimension_semantics=("parallel", "parallel")),
        cost_estimate=pl.CostEstimate(
            flops=3 * N * C_pad * M_pad,
            transcendentals=0,
            bytes_accessed=int(2 * N * C_pad * M_pad * 4)),
    )(y, scale, bias)

    # ---- glue: unpad + reshape (output is already NCHW order: no transpose) --
    return out[:, :Cout, :HoWo].reshape(N, Cout, Ho, Wo)


if __name__ == "__main__":
    key = jax.random.PRNGKey(0)
    k_x, k_w, k_g, k_b = jax.random.split(key, 4)

    # BasicConv2d(in_planes=4, out_planes=8, kernel_size=3, stride=1, padding=1)
    N, Cin, H, W = 2, 4, 16, 16
    Cout, KH, KW = 8, 3, 3

    x = jax.random.normal(k_x, (N, Cin, H, W), jnp.float32)
    weight = 0.1 * jax.random.normal(k_w, (Cout, Cin, KH, KW), jnp.float32)
    gamma = 1.0 + 0.1 * jax.random.normal(k_g, (Cout,), jnp.float32)
    beta = 0.1 * jax.random.normal(k_b, (Cout,), jnp.float32)

    out = basic_conv2d(x, weight, gamma, beta, stride=1, padding=1,
                       dilation=1, relu=True)
    jax.block_until_ready(out)
    assert out.shape == (N, Cout, H, W), out.shape

    # Pure-JAX f32 reference (PyTorch training-mode BN semantics); bf16 MXU
    # operands -> loose tolerance.
    y_ref = jax.lax.conv_general_dilated(
        x, weight, window_strides=(1, 1), padding=((1, 1), (1, 1)),
        rhs_dilation=(1, 1), dimension_numbers=("NCHW", "OIHW", "NCHW"),
        precision=jax.lax.Precision.HIGHEST)
    mu = y_ref.mean(axis=(0, 2, 3), keepdims=True)
    va = y_ref.var(axis=(0, 2, 3), keepdims=True)
    z = (y_ref - mu) / jnp.sqrt(va + 1e-5) * gamma.reshape(1, -1, 1, 1) \
        + beta.reshape(1, -1, 1, 1)
    ref = jnp.where(z >= 0, z, 0.01 * z)
    err = float(jnp.max(jnp.abs(out - ref)))
    assert err < 1e-1, f"max abs error too large: {err}"

    print("KERNEL_OK")
</pallas_src>

<mosaic_0001>
module attributes {stable_mosaic.version = 11 : i64} {
  func.func @conv_stats_kernel(%arg0: i32, %arg1: i32, %arg2: memref<8x48xbf16, #tpu.memory_space<vmem>>, %arg3: memref<1x48x256xbf16, #tpu.memory_space<vmem>>, %arg4: memref<1x8x256xf32, #tpu.memory_space<vmem>>, %arg5: memref<1x1x8x2xf32, #tpu.memory_space<vmem>>) attributes {dimension_semantics = [#tpu.dimension_semantics<parallel>, #tpu.dimension_semantics<parallel>], iteration_bounds = array<i64: 2, 1>, scalar_prefetch = 0 : i64, scratch_operands = 0 : i64, tpu.core_type = #tpu.core_type<tc>, window_params = [{pipeline_mode = #tpu.pipeline_mode<synchronous>, transform_indices = @transform_0, window_bounds = array<i64: 8, 48>}, {transform_indices = @transform_1, window_bounds = array<i64: 1, 48, 256>}, {transform_indices = @transform_2, window_bounds = array<i64: 1, 8, 256>}, {transform_indices = @transform_3, window_bounds = array<i64: 1, 1, 8, 2>}]} {
    %c0 = arith.constant 0 : index
    %c0_0 = arith.constant 0 : index
    %0 = vector.load %arg2[%c0, %c0_0] : memref<8x48xbf16, #tpu.memory_space<vmem>>, vector<8x48xbf16>
    %c0_1 = arith.constant 0 : index
    %c0_2 = arith.constant 0 : index
    %c0_3 = arith.constant 0 : index
    %1 = vector.load %arg3[%c0_1, %c0_2, %c0_3] : memref<1x48x256xbf16, #tpu.memory_space<vmem>>, vector<1x48x256xbf16>
    %2 = vector.shape_cast %1 : vector<1x48x256xbf16> to vector<48x256xbf16>
    %cst = arith.constant dense<0.000000e+00> : vector<8x256xf32>
    %3 = tpu.matmul %0, %2, %cst {dimension_numbers = #tpu.dot_dimension_numbers<[1], [0], [0], [1], [0, 0, 1, 1], [], []>} : vector<8x48xbf16>, vector<48x256xbf16>, vector<8x256xf32> -> vector<8x256xf32>
    %c0_4 = arith.constant 0 : index
    %c0_5 = arith.constant 0 : index
    %c0_6 = arith.constant 0 : index
    %4 = vector.load %arg4[%c0_4, %c0_5, %c0_6] : memref<1x8x256xf32, #tpu.memory_space<vmem>>, vector<1x8x256xf32>
    %5 = vector.shape_cast %4 : vector<1x8x256xf32> to vector<8x256xf32>
    %6 = vector.shape_cast %3 : vector<8x256xf32> to vector<1x8x256xf32>
    tpu.vector_store %arg4[%c0_4, %c0_5, %c0_6], %6 {strides = array<i32>} : memref<1x8x256xf32, #tpu.memory_space<vmem>>, vector<1x8x256xf32>,
    %cst_7 = arith.constant dense<0.000000e+00> : vector<8xf32>
    %7 = vector.multi_reduction <add>, %3, %cst_7 [1] : vector<8x256xf32> to vector<8xf32>
    %8 = vector.shape_cast %7 : vector<8xf32> to vector<8x1xf32>
    %c0_8 = arith.constant 0 : index
    %c0_9 = arith.constant 0 : index
    %c0_10 = arith.constant 0 : index
    %c0_11 = arith.constant 0 : index
    %9 = vector.load %arg5[%c0_8, %c0_9, %c0_10, %c0_11] : memref<1x1x8x2xf32, #tpu.memory_space<vmem>>, vector<1x1x8x1xf32>
    %10 = vector.shape_cast %9 : vector<1x1x8x1xf32> to vector<8x1xf32>
    %11 = vector.shape_cast %8 : vector<8x1xf32> to vector<1x1x8x1xf32>
    tpu.vector_store %arg5[%c0_8, %c0_9, %c0_10, %c0_11], %11 {strides = array<i32>} : memref<1x1x8x2xf32, #tpu.memory_space<vmem>>, vector<1x1x8x1xf32>,
    %12 = arith.mulf %3, %3 : vector<8x256xf32>
    %cst_12 = arith.constant dense<0.000000e+00> : vector<8xf32>
    %13 = vector.multi_reduction <add>, %12, %cst_12 [1] : vector<8x256xf32> to vector<8xf32>
    %14 = vector.shape_cast %13 : vector<8xf32> to vector<8x1xf32>
    %c0_13 = arith.constant 0 : index
    %c0_14 = arith.constant 0 : index
    %c0_15 = arith.constant 0 : index
    %c1 = arith.constant 1 : index
    %15 = vector.load %arg5[%c0_13, %c0_14, %c0_15, %c1] : memref<1x1x8x2xf32, #tpu.memory_space<vmem>>, vector<1x1x8x1xf32>
    %16 = vector.shape_cast %15 : vector<1x1x8x1xf32> to vector<8x1xf32>
    %17 = vector.shape_cast %14 : vector<8x1xf32> to vector<1x1x8x1xf32>
    tpu.vector_store %arg5[%c0_13, %c0_14, %c0_15, %c1], %17 {strides = array<i32>} : memref<1x1x8x2xf32, #tpu.memory_space<vmem>>, vector<1x1x8x1xf32>,
    return
  }
  func.func @transform_0(%arg0: i32, %arg1: i32) -> (i32, i32) {
    %c0_i32 = arith.constant 0 : i32
    %c0_i32_0 = arith.constant 0 : i32
    %c0_i32_1 = arith.constant 0 : i32
    return %c0_i32, %c0_i32_0 : i32, i32
  }
  func.func @transform_1(%arg0: i32, %arg1: i32) -> (i32, i32, i32) {
    %c0_i32 = arith.constant 0 : i32
    %c0_i32_0 = arith.constant 0 : i32
    return %arg0, %c0_i32, %arg1 : i32, i32, i32
  }
  func.func @transform_2(%arg0: i32, %arg1: i32) -> (i32, i32, i32) {
    %c0_i32 = arith.constant 0 : i32
    %c0_i32_0 = arith.constant 0 : i32
    return %arg0, %c0_i32, %arg1 : i32, i32, i32
  }
  func.func @transform_3(%arg0: i32, %arg1: i32) -> (i32, i32, i32, i32) {
    %c0_i32 = arith.constant 0 : i32
    %c0_i32_0 = arith.constant 0 : i32
    %c0_i32_1 = arith.constant 0 : i32
    return %arg0, %arg1, %c0_i32, %c0_i32_0 : i32, i32, i32, i32
  }
}

</mosaic_0001>

<bundles_post_ra>
// kernel: tpu_custom_call.1
= control target key start
LH: loop header
LB: loop body
LE: loop exit
PB: predicated region body
PF: predicated region fallthrough
CT: control target
= control target key end

     0   :  { %s938_s0 = inlined_call_operand.hbm [shape: bf16[8,48], index: 0, kind: input, shape index: {}]   ;;  %s939_s1 = inlined_call_operand.hbm [shape: bf16[2,48,256], index: 1, kind: input, shape index: {}]   ;;  %s940_s2 = inlined_call_operand.hbm [shape: f32[2,8,256], index: 2, kind: output, shape index: {0}]   ;;  %s941_s3 = inlined_call_operand.vmem [shape: f32[2,1,8,2], index: 3, kind: output, shape index: {1}]  }
   0x1   :  { %944 = sst [smem:[#allocation11_spill]] %s938_s0 }
   0x2   :  { %9 = vsyncpa [#allocation3], 0 }
   0x3   :  { %10 = vsyncpa [#allocation6], 0 }
   0x4   :  { %12 = vsyncpa [#allocation6 + $0x1], 0 }
   0x5   :  { %13 = vsyncpa [#allocation4], 0 }
   0x6   :  { %15 = vsyncpa [#allocation4 + $0x1], 0  ;;  %s769_s12 = smov 0   ;;  %s771_s13 = smov 0  }
   0x7   :  { %s773_s14 = smov 0   ;;  %s775_s15 = smov 0  }
   0x8   :  { %s777_s16 = smov 0   ;;  %s779_s17 = smov 0  }
   0x9 LB: > { %s492_s18 = sadd.s32 4294967295, %s741_s17   ;;  %s493_s19 = sadd.s32 4294967294, %s741_s17   ;;  %s741_s17 = sphi %s779_s17, %s21_s17   ;;  %s737_s16 = sphi %s777_s16, %s962_s16   ;;  %s733_s15 = sphi %s775_s15, %s961_s15   ;;  %s729_s14 = sphi %s773_s14, %s960_s14   ;;  %s725_s13 = sphi %s771_s13, %s959_s13   ;;  %s721_s12 = sphi %s769_s12, %s958_s12  }
   0xa   : > { %s63_s20 = sadd.s32 1, %s729_s14  ;;  %p70_p0 = scmp.ne.s32.totalorder %s729_s14, %s725_s13 }
   0xb   : > { %p71_p1 = scmp.eq.s32.totalorder %s741_s17, 0  ;;  %p76_p2 = scmp.ne.s32.totalorder %s725_s13, %s721_s12 }
   0xc   : > { %p807_p3 = scmp.eq.s32.totalorder %s492_s18, 0  ;;  %p102_p4 = scmp.eq.s32.totalorder %s492_s18, 1 }
   0xd   : > { %p811_p5 = por %p71_p1, %p70_p0  ;;  %p108_p6 = scmp.eq.s32.totalorder %s493_s19, 1 }
   0xe   : > { %p817_p7 = por %p807_p3, %p76_p2  ;;  %p821_p8 = por %p102_p4, %p70_p0 }
   0xf   : > { %p825_p9 = por %p108_p6, %p76_p2  ;;  %p494_p10 = scmp.ge.s32.totalorder %s741_s17, 1 }
  0x10   : > { %s947_s23 = scalar_select %p817_p7, 1, 0 }
  0x11   : > { %s948_s24 = scalar_select %p821_p8, 1, 0 }
  0x12   : > { %s949_s25 = scalar_select %p825_p9, 1, 0 }
  0x13   : > { %p143_p11 = scmp.lt.s32.totalorder %s741_s17, 3  ;;  %s743_s27 = smov [#allocation2]  }
  0x14   : > { %s156_s28 = sshll.u32 %s743_s27, 4  ;;  %p539_p1 = scmp.lt.s32.totalorder %s741_s17, 2  ;;  %s157_s28 = int_to_ptr.vmem [resolvable:$true] %s156_s28 }
  0x15   : > { %p832_p13 = pnand %p494_p10, %p143_p11  ;;  %s33_s4 = sadd.s32 1, %s737_s16 }
  0x16   : > { %p841_p4 = pnand %p539_p1, %p811_p5  ;;  %p35_p6 = scmp.ge.s32.totalorder %s33_s4, 2 }
  0x17   : > { %p526_p0 = pneg %p832_p13  ;;  %s167_s5 = sand.u32 1, %s729_s14  }
  0x18   : > { %s614_s6 = scalar_lea.vmem %s157_s28, 64  ;;  %p622_p8 = scmp.lt.s32.totalorder %s157_s28, %s157_s28 }
  0x19   : > { %p847_p2 = pnand %p526_p0, %p807_p3  ;;  %p615_p11 = scmp.ne.s32.totalorder %s157_s28, %s614_s6 }
  0x1a   : > { %p623_p5 = scmp.lt.s32.totalorder %s614_s6, %s614_s6 }
  0x1b   : > { %p605_p10 = pneg %p847_p2 }
  0x1c   : > { %p624_p1 = por %p623_p5, %p622_p8 }
  0x1d   : > { %p617_p12 = pnand %p615_p11, %p605_p10 }
  0x1f   : > { %p618_p9 = pneg %p617_p12 }
  0x21   : > { %p625_p7 = pnand %p624_p1, %p618_p9 }
  0x23   : > { %628 = shalt.err (!%p625_p7)
}
  0x24   : > { %s953_s0 = sld [smem:[#allocation11_spill]]  ;;  %s964_s4 = smov (%p35_p6, %s33_s4), 0 }
  0x25   : > { %s515_s9 = smul.u32 48, %s167_s5  ;;  %s58_s10 = ssub.s32 %s737_s16, %s964_s4 }
  0x26   : > { %s516_s11 = smul.u32 768, %s737_s16  ;;  %p61_p8 = scmp.eq.s32.totalorder %s58_s10, 0 }
  0x27   : > { %s171_s27 = scalar_lea.vmem [#allocation5], %s515_s9  ;;  %s168_s7 = scalar_lea.sflag [#allocation6], %s167_s5 }
  0x28   : > { %s179_s22 = scalar_lea.hbm %s939_s1, %s516_s11  ;;  %s180_s30 = sshll.u32 %s171_s27, 4  ;;  %s181_s30 = int_to_ptr.vmem [resolvable:$true] %s180_s30 }
  0x29   : > { %s871_s6 = scalar_select %p61_p8, %s729_s14, %s63_s20  }
  0x2a   : > { %529 = dma.hbm_to_vmem [thread:$0]  (!%p847_p2), %s953_s0, 64, %s157_s28, [#allocation3]  }
  0x2b   : > { %p631_p7 = pneg %p841_p4  ;;  %s642_s28 = scalar_lea.vmem %s181_s30, 768 }
  0x2c   : > { %p643_p9 = scmp.ne.s32.totalorder %s181_s30, %s642_s28  ;;  %s744_s8 = smov [#allocation5]  }
  0x2d   : > { %s647_s0 = sshll.u32 %s744_s8, 4  ;;  %s648_s0 = int_to_ptr.vmem [resolvable:$false] %s647_s0 }
  0x2e   : > { %p645_p12 = pnand %p643_p9, %p631_p7  ;;  %s649_s10 = scalar_lea.vmem %s648_s0, 1536 }
  0x2f   : > { %p650_p2 = scmp.lt.s32.totalorder %s181_s30, %s648_s0  ;;  %p651_p6 = scmp.lt.s32.totalorder %s649_s10, %s642_s28 }
  0x30   : > { %p646_p0 = pneg %p645_p12 }
  0x31   : > { %p652_p10 = por %p651_p6, %p650_p2 }
  0x33   : > { %p653_p11 = pnand %p652_p10, %p646_p0 }
  0x35   : > { %656 = shalt.err (!%p653_p11)
}
  0x36   : > { %s745_s9 = smov 128   ;;  %s746_s20 = smov 8  }
  0x37   : > { %533 = dma.hbm_to_vmem [thread:$0]  (!%p841_p4), %s179_s22, 768, %s181_s30, %s168_s7, %s745_s9, %s745_s9, %s746_s20  }
  0x38   : > { %192 = sbr.rel (%p832_p13) target bundleno = 420 (0x1a4), region = 28 }
  0x3d   : > { %708 = dma.done.wait (%p807_p3), [#allocation3], 64  }
  0x3e   : > { %710 = vsyncadd (%p807_p3), [#allocation3], 4294967232  ;;  %s884_s0 = sand.u32 1, %s725_s13   ;;  %p954_p5 = scmp.ne.s32.totalorder %s947_s23, 0 }
  0x3f   : > { %s517_s5 = smul.u32 48, %s884_s0  ;;  %s199_s11 = scalar_lea.sflag [#allocation6], %s884_s0 }
  0x41   : > { %s202_s18 = scalar_lea.vmem [#allocation5], %s517_s5 }
  0x42   : > { %712 = dma.done.wait (%p954_p5), %s199_s11, 768  }
  0x43   : > { %714 = vsyncadd (%p954_p5), %s199_s11, 4294966528  ;;  %v747_v0 = vmov 0   ;;  %v594_v1 = vld [vmem:[%s202_s18 + $0x24] ss:$8 sps:$4 sm:$0xff]   ;;  %v596_v2 = vld [vmem:[%s202_s18 + $0x20] ss:$8 sps:$4 sm:$0xff]  }
  0x44   : > { %315 = vmatprep.mubr.bf16.mxu0 %v747_v0  ;;  %293 = vmatprep.subr.bf16.mxu0 %v594_v1  ;;  %v597_v3 = vld [vmem:[%s202_s18 + $0x14] ss:$8 sps:$4 sm:$0xff]   ;;  %v599_v4 = vld [vmem:[%s202_s18 + $0x10] ss:$8 sps:$4 sm:$0xff]   ;;  %v600_v5 = vld [vmem:[%s202_s18 + $0x4] ss:$8 sps:$4 sm:$0xff]  }
  0x45   : > { %294 = vmatpush1.bf16.msra.mxu0 %v596_v2  ;;  %v602_v6 = vld [vmem:[%s202_s18] ss:$8 sps:$4 sm:$0xff]   ;;  %v242_v7 = vld [vmem:[#allocation2] sm:$0xf]  ;;  %vm279_vm0 = vcmask 392192   ;;  %s500_s21 = sshll.u32 %s884_s0, 4 }
  0x46   : > { %295 = vmatprep.subr.bf16.mxu0 %v597_v3  ;;  %s222_s23 = scalar_lea.vmem [#allocation7], %s500_s21  ;;  %s514_s29 = sshll.u32 %s733_s15, 8 }
  0x47   : > { %s362_s26 = sshll.u32 %s222_s23, 4  ;;  %s360_s27 = scalar_lea.hbm %s940_s2, %s514_s29  ;;  %s363_s26 = int_to_ptr.vmem [resolvable:$true] %s362_s26 }
  0x48   : > { %s339_s30 = scalar_lea.sflag [#allocation4], %s884_s0  ;;  %s657_s7 = scalar_lea.vmem %s363_s26, 256 }
  0x49   : > { %296 = vmatpush1.bf16.msra.mxu0 %v599_v4  ;;  %p658_p3 = scmp.ne.s32.totalorder %s363_s26, %s657_s7  ;;  %p955_p13 = scmp.ne.s32.totalorder %s948_s24, 0 }
  0x4a   : > { %297 = vmatprep.subr.bf16.mxu0 %v600_v5  ;;  %s748_s28 = smov [#allocation7]  }
  0x4b   : > { %p659_p4 = pnand %p658_p3, %p955_p13  ;;  %s661_s8 = sshll.u32 %s748_s28, 4  ;;  %s662_s8 = int_to_ptr.vmem [resolvable:$false] %s661_s8 }
  0x4c   : > { %s663_s10 = scalar_lea.vmem %s662_s8, 512  ;;  %p664_p8 = scmp.lt.s32.totalorder %s363_s26, %s662_s8 }
  0x4d   : > { %298 = vmatpush1.bf16.msra.mxu0 %v602_v6  ;;  %p660_p1 = pneg %p659_p4  ;;  %p665_p7 = scmp.lt.s32.totalorder %s663_s10, %s657_s7 }
  0x4f   : > { %p666_p9 = por %p665_p7, %p664_p8 }
  0x50   : > { %508 = vmatmul.mubr.msk.bf16.vlgmr.msra.gmra.mxu0 %vm279_vm0, %v242_v7 }
  0x51   : > { %p667_p12 = pnand %p666_p9, %p660_p1 }
 0x110   : > { %v317_v8 = vpop.f32.mrf.mxu0 }
 0x111   : > { %324 = vst [vmem:[%s222_s23] sm:$0xff] %v317_v8  ;;  %v331_v13 = vmul.f32 %v317_v8, %v317_v8 }
 0x112   : > { %v319_v9 = vpop.f32.mrf.mxu0 }
 0x113   : > { %325 = vst [vmem:[%s222_s23 + $0x8] sm:$0xff] %v319_v9  ;;  %v326_v10 = vadd.f32 %v319_v9, %v317_v8  ;;  %v332_v11 = vmul.f32 %v319_v9, %v319_v9 }
 0x114   : > { %v321_v12 = vpop.f32.mrf.mxu0 }
 0x115   : > { %327 = vadd.xlane.f32.xlu0 %v326_v10  ;;  %v333_v15 = vadd.f32 %v332_v11, %v331_v13 }
 0x116   : > { %v322_v14 = vpop.f32.mrf.mxu0 }
 0x119   : > { %334 = vadd.xlane.f32.xlu0 %v333_v15 }
 0x11a   : > { %670 = shalt.err (!%p667_p12)
}
 0x11b   : > { %s671_s9 = scalar_lea.hbm %s360_s27, 256  ;;  %s675_s5 = scalar_lea.hbm %s940_s2, 512 }
 0x11c   : > { %p672_p0 = scmp.ne.s32.totalorder %s360_s27, %s671_s9  ;;  %p676_p10 = scmp.lt.s32.totalorder %s360_s27, %s940_s2 }
 0x11d   : > { %p677_p11 = scmp.lt.s32.totalorder %s675_s5, %s671_s9 }
 0x11e   : > { %p673_p2 = pnand %p672_p0, %p955_p13 }
 0x11f   : > { %p678_p5 = por %p677_p11, %p676_p10 }
 0x120   : > { %p674_p6 = pneg %p673_p2 }
 0x122   : > { %p679_p3 = pnand %p678_p5, %p674_p6 }
 0x124   : > { %682 = shalt.err (!%p679_p3)
}
 0x125   : > { %524 = dma.vmem_to_hbm [thread:$0]  (%p955_p13), %s363_s26, 256, %s360_s27, %s339_s30   ;;  %vm329_vm1 = vcmask 7168   ;;  %vm336_vm2 = vcmask 15368  }
 0x126   : > { %p234_p4 = scmp.lt.s32.totalorder %s733_s15, 1 }
 0x128   : > { %s966_s15 = smov (!%p234_p4, %s733_s15), 1 }
 0x129   : > { %s501_s21 = sshll.u32 %s966_s15, 3 }
 0x12a   : > { %s240_s19 = scalar_lea.vmem %s941_s3, %s501_s21 }
 0x19e   : > { %v328_v16 = vpop.xlane.xlu0 %327 }
 0x19f   : > { %330 = vst.msk [vmem:[%s240_s19] sm:$0xff] %vm329_vm1, %v328_v16 }
 0x1a2   : > { %v335_v17 = vpop.xlane.xlu0 %334 }
 0x1a3   : > { %337 = vst.msk [vmem:[%s240_s19] sm:$0xff] %vm336_vm2, %v335_v17 }
 0x1a4 PF: > { %s377_s24 = sand.u32 1, %s721_s12   ;;  %p956_p1 = scmp.ne.s32.totalorder %s949_s25, 0 }
 0x1a5   : > { %p957_p13 = scmp.ge.s32.totalorder %s741_s17, 2  ;;  %s378_s15 = scalar_lea.sflag [#allocation4], %s377_s24 }
 0x1a7   : > { %p535_p8 = pnand %p957_p13, %p956_p1 }
 0x1a9   : > { %p536_p7 = pneg %p535_p8 }
 0x1ab   : > { %716 = dma.done.wait (%p536_p7), %s378_s15, 256  }
 0x1ac   : > { %718 = vsyncadd (%p536_p7), %s378_s15, 4294967040  ;;  %s21_s17 = sadd.s32 1, %s741_s17   ;;  %s958_s12 = smov %s725_s13 }
 0x1ad   : > { %p18_p9 = scmp.ge.s32.totalorder %s21_s17, 4   ;;  %s959_s13 = smov %s729_s14 }
 0x1ae   : > { %s960_s14 = smov %s871_s6  ;;  %s961_s15 = smov %s737_s16 }
 0x1af   : > { %s962_s16 = smov %s964_s4  ;;  %20 = sbr.rel (!%p18_p9) target bundleno = 9 (0x9), region = 90 }
 0x1b4   :  { %393 = vsyncpa [#allocation3], 1 }
 0x1b5   :  { %395 = vsyncpa [#allocation3 + $0x1], 1 }
 0x1b6   :  { %396 = vsyncpa [#allocation6], 1 }
 0x1b7   :  { %398 = vsyncpa [#allocation6 + $0x1], 1 }
 0x1b8   :  { %399 = vsyncpa [#allocation4], 1 }
 0x1b9   :  { %401 = vsyncpa [#allocation4 + $0x1], 1 }

</bundles_post_ra>
